<compile_context>
chip_gen: v7x
topology: tpu7x:2x2x1
jax: 0.10.0
libtpu: 0.0.40
codegen_flags: <defaults>
</compile_context>

<pallas_src>
import functools
import math

import jax
import jax.numpy as jnp
from jax.experimental import pallas as pl
from jax.experimental.pallas import tpu as pltpu

LANE = 128
_MIB = 1024 * 1024


def _round_up(x, m):
    return ((x + m - 1) // m) * m


def _itemsize(dt):
    return jnp.dtype(dt).itemsize


def _vmem_capacity_bytes():
    try:
        cap = getattr(pltpu.get_tpu_info(), "vmem_capacity_bytes", None)
        if cap:
            return int(cap)
    except Exception:
        pass
    return 64 * _MIB  # conservative default (v7x-class)


def _hw_first(din_p, dout_p):
    """Use the A @ (H @ W) order only when it meaningfully shrinks the N^2 matmul's
    inner width AND keeps >= 256 output lanes for the 256-wide MXU (v6e/v7x)."""
    return (din_p >= 2 * dout_p) and (dout_p >= 256)


# ----------------------------- Pallas kernels ---------------------------------


def _layer_kernel(*refs, bk, apply_relu, fuse_w, x_resident):
    """Fused GCN layer tile.

    Grid = (row tiles of A, k tiles of A).  Accumulates A_tile @ X_k into an f32
    VMEM scratch; on the last k step applies the fused epilogue
    (optional @ W, + bias, optional relu) and stores in o_ref.dtype.
    X is either fully VMEM-resident (sliced with pl.ds) or k-tiled.
    """
    if fuse_w:
        a_ref, x_ref, w_ref, b_ref, o_ref, acc_ref = refs
    else:
        a_ref, x_ref, b_ref, o_ref, acc_ref = refs
        w_ref = None

    k = pl.program_id(1)

    @pl.when(k == 0)
    def _():
        acc_ref[...] = jnp.zeros_like(acc_ref)

    if x_resident:
        start = pl.multiple_of(k * bk, bk)
        x_blk = x_ref[pl.ds(start, bk), :]
    else:
        x_blk = x_ref[...]
    acc_ref[...] += jnp.dot(a_ref[...], x_blk, preferred_element_type=jnp.float32)

    @pl.when(k == pl.num_programs(1) - 1)
    def _():
        out = acc_ref[...]
        if fuse_w:
            out = jnp.dot(out.astype(jnp.bfloat16), w_ref[...],
                          preferred_element_type=jnp.float32)
        out = out + b_ref[...]
        if apply_relu:
            out = jnp.maximum(out, 0.0)
        o_ref[...] = out.astype(o_ref.dtype)


def _transform_kernel(x_ref, w_ref, b_ref, o_ref, *, apply_relu):
    """Row-tiled dense transform: O = act(X @ W + b). f32 accumulate/epilogue."""
    out = jnp.dot(x_ref[...], w_ref[...], preferred_element_type=jnp.float32)
    out = out + b_ref[...]
    if apply_relu:
        out = jnp.maximum(out, 0.0)
    o_ref[...] = out.astype(o_ref.dtype)


def _fused_gcn_kernel(*refs, n_layers):
    """Whole-network kernel for graphs that fit in VMEM: A_hat DMA'd exactly once."""
    a = refs[0][...]
    h = refs[1][...]
    o_ref = refs[-1]
    for l in range(n_layers):
        w = refs[2 + 2 * l][...]
        b = refs[3 + 2 * l][...]
        din_p, dout_p = w.shape
        if _hw_first(din_p, dout_p):
            z = jnp.dot(h, w, preferred_element_type=jnp.float32).astype(jnp.bfloat16)
            out = jnp.dot(a, z, preferred_element_type=jnp.float32) + b
        else:
            s = jnp.dot(a, h, preferred_element_type=jnp.float32).astype(jnp.bfloat16)
            out = jnp.dot(s, w, preferred_element_type=jnp.float32) + b
        if l < n_layers - 1:
            h = jnp.maximum(out, 0.0).astype(jnp.bfloat16)
        else:
            o_ref[...] = out.astype(o_ref.dtype)


# ----------------------------- kernel wrappers ---------------------------------


def _pick_tiles(n_p, x_width_p, acc_width_p, dout_p, out_itemsize, budget,
                max_bm=None, max_bk=None):
    """Pick (bm, bk, x_resident) for the layer kernel within the VMEM budget.

    bm/bk are 128-multiple divisors of n_p (no extra padding of the N^2 operand).
    Preference: X resident, then the largest bk (<=4096), then the largest bm
    (<=1024) -- amortizes per-grid-step overhead against big A DMAs.
    """
    divisors = [d for d in range(LANE, n_p + 1, LANE) if n_p % d == 0]
    bm_cap = min(1024, max_bm or 1024)
    bk_cap = min(4096, max_bk or 4096)
    bm_cands = [d for d in reversed(divisors) if d <= bm_cap] or [divisors[0]]
    bk_cands = [d for d in reversed(divisors) if d <= bk_cap] or [divisors[0]]
    usable = int(budget * 0.9)

    def footprint(bm, bk, x_res):
        a_bytes = 2 * bm * bk * 2                               # bf16 A, double-buffered
        x_bytes = (2 * n_p * x_width_p * 2) if x_res else (2 * bk * x_width_p * 2)
        w_bytes = 2 * acc_width_p * dout_p * 2                  # resident W upper bound
        b_bytes = 2 * dout_p * 4
        acc_bytes = bm * acc_width_p * 4                        # f32 accumulator scratch
        out_bytes = 2 * bm * dout_p * out_itemsize
        return a_bytes + x_bytes + w_bytes + b_bytes + acc_bytes + out_bytes

    for x_res in (True, False):
        for bk in bk_cands:
            for bm in bm_cands:
                if footprint(bm, bk, x_res) <= usable:
                    return bm, bk, x_res
    return divisors[0], divisors[0], False


def gcn_layer(a_p, x_p, b_p, w_p=None, *, fuse_w, apply_relu, out_dtype, budget,
              max_bm=None, max_bk=None):
    """One fused GCN layer: act((A @ X) [@ W] + b), A tiled (bm, bk), X resident."""
    n_p = a_p.shape[0]
    x_width = x_p.shape[1]
    dout_p = w_p.shape[1] if fuse_w else x_width
    acc_width = x_width
    bm, bk, x_res = _pick_tiles(n_p, x_width, acc_width, dout_p,
                                _itemsize(out_dtype), budget, max_bm, max_bk)

    in_specs = [pl.BlockSpec((bm, bk), lambda i, k: (i, k))]
    args = [a_p]
    if x_res:
        in_specs.append(pl.BlockSpec((n_p, x_width), lambda i, k: (0, 0)))
    else:
        in_specs.append(pl.BlockSpec((bk, x_width), lambda i, k: (k, 0)))
    args.append(x_p)
    if fuse_w:
        in_specs.append(pl.BlockSpec(w_p.shape, lambda i, k: (0, 0)))
        args.append(w_p)
    in_specs.append(pl.BlockSpec((1, dout_p), lambda i, k: (0, 0)))
    args.append(b_p)

    flops = 2 * n_p * n_p * x_width + (2 * n_p * acc_width * dout_p if fuse_w else 0)
    bytes_accessed = (a_p.size * 2 + x_p.size * 2
                      + (w_p.size * 2 if fuse_w else 0)
                      + b_p.size * 4 + n_p * dout_p * _itemsize(out_dtype))

    kernel = functools.partial(_layer_kernel, bk=bk, apply_relu=apply_relu,
                               fuse_w=fuse_w, x_resident=x_res)
    return pl.pallas_call(
        kernel,
        out_shape=jax.ShapeDtypeStruct((n_p, dout_p), out_dtype),
        grid_spec=pltpu.PrefetchScalarGridSpec(
            num_scalar_prefetch=0,
            grid=(n_p // bm, n_p // bk),
            in_specs=in_specs,
            out_specs=pl.BlockSpec((bm, dout_p), lambda i, k: (i, 0)),
            scratch_shapes=[pltpu.VMEM((bm, acc_width), jnp.float32)],
        ),
        compiler_params=pltpu.CompilerParams(
            dimension_semantics=("parallel", "arbitrary"),
            vmem_limit_bytes=int(budget)),
        cost_estimate=pl.CostEstimate(flops=int(flops), transcendentals=0,
                                      bytes_accessed=int(bytes_accessed)),
    )(*args)


def transform(x, w, b, *, apply_relu, out_dtype, budget):
    """O = act(X @ W + b), tiled over node rows (used for the H @ W pre-transform)."""
    n_p, din_p = x.shape
    dout_p = w.shape[1]
    divisors = [d for d in range(LANE, n_p + 1, LANE) if n_p % d == 0]
    bm = max([d for d in divisors if d <= 512] or [divisors[0]])
    flops = 2 * n_p * din_p * dout_p
    bytes_accessed = (x.size * _itemsize(x.dtype) + w.size * _itemsize(w.dtype)
                      + b.size * 4 + n_p * dout_p * _itemsize(out_dtype))
    return pl.pallas_call(
        functools.partial(_transform_kernel, apply_relu=apply_relu),
        out_shape=jax.ShapeDtypeStruct((n_p, dout_p), out_dtype),
        grid_spec=pltpu.PrefetchScalarGridSpec(
            num_scalar_prefetch=0,
            grid=(n_p // bm,),
            in_specs=[
                pl.BlockSpec((bm, din_p), lambda i: (i, 0)),
                pl.BlockSpec((din_p, dout_p), lambda i: (0, 0)),
                pl.BlockSpec((1, dout_p), lambda i: (0, 0)),
            ],
            out_specs=pl.BlockSpec((bm, dout_p), lambda i: (i, 0)),
        ),
        compiler_params=pltpu.CompilerParams(
            dimension_semantics=("parallel",),
            vmem_limit_bytes=int(budget)),
        cost_estimate=pl.CostEstimate(flops=int(flops), transcendentals=0,
                                      bytes_accessed=int(bytes_accessed)),
    )(x, w, b)


def _fused_forward(a_p, h_p, w_pads, b_pads, budget):
    n_layers = len(w_pads)
    n_p = a_p.shape[0]
    dout_last = w_pads[-1].shape[1]
    args = [a_p, h_p]
    in_specs = [pl.BlockSpec(a_p.shape, lambda: (0, 0)),
                pl.BlockSpec(h_p.shape, lambda: (0, 0))]
    flops = 0
    bytes_accessed = a_p.size * 2 + h_p.size * 2 + n_p * dout_last * 4
    for w, b in zip(w_pads, b_pads):
        args += [w, b]
        in_specs += [pl.BlockSpec(w.shape, lambda: (0, 0)),
                     pl.BlockSpec(b.shape, lambda: (0, 0))]
        flops += 2 * n_p * n_p * min(w.shape) + 2 * n_p * w.shape[0] * w.shape[1]
        bytes_accessed += w.size * 2 + b.size * 4
    return pl.pallas_call(
        functools.partial(_fused_gcn_kernel, n_layers=n_layers),
        out_shape=jax.ShapeDtypeStruct((n_p, dout_last), jnp.float32),
        in_specs=in_specs,
        out_specs=pl.BlockSpec((n_p, dout_last), lambda: (0, 0)),
        compiler_params=pltpu.CompilerParams(vmem_limit_bytes=int(budget)),
        cost_estimate=pl.CostEstimate(flops=int(flops), transcendentals=0,
                                      bytes_accessed=int(bytes_accessed)),
    )(*args)


# ----------------------------- Model (glue) -----------------------------------


class PallasGCN:
    """Concrete Pallas implementation of the AbstractGNN forward pass (eval mode)."""

    def __init__(self, n_layers, n_nodes, in_feats, hidden_channels,
                 number_classes, dropout, key):
        self.n_layers = n_layers
        self.n_nodes = n_nodes
        self.in_feats = in_feats
        self.hidden_channels = hidden_channels
        self.number_classes = number_classes
        self.dropout_frac = dropout  # cached; identity in eval-mode forward

        dims = [in_feats] + [hidden_channels] * (n_layers - 1) + [number_classes]
        self.dims = dims
        self.dims_p = [_round_up(d, LANE) for d in dims]  # lane-dense padded widths

        # Per-generation VMEM budget / fused-path threshold.
        cap = _vmem_capacity_bytes()
        self._vmem_budget = int(min(cap * 3 // 4, 100 * _MIB))
        if cap <= 64 * _MIB:
            # v7x-class: 64 MiB VMEM, 2 TensorCores. Keep medium graphs on the
            # row-parallel tiled path so both cores are used.
            self._fused_threshold = 8 * _MIB
        else:
            # v5e/v6e: 128 MiB VMEM -> larger A-resident fused window.
            self._fused_threshold = min(self._vmem_budget // 2, 48 * _MIB)

        # Cached padded bf16 A_hat (rebuilt only when edge_index changes).
        self._a_cache = None
        self._a_cache_key = None

        self.weights_f32, self.biases_f32 = [], []
        self.w_pad, self.b_pad = [], []
        for l in range(n_layers):
            key, wk = jax.random.split(key)
            fan_in, fan_out = dims[l], dims[l + 1]
            limit = math.sqrt(6.0 / (fan_in + fan_out))  # Glorot-uniform
            w = jax.random.uniform(wk, (fan_in, fan_out), jnp.float32, -limit, limit)
            b = jnp.zeros((fan_out,), jnp.float32)
            self.weights_f32.append(w)
            self.biases_f32.append(b)
            wp = jnp.zeros((self.dims_p[l], self.dims_p[l + 1]), jnp.bfloat16)
            wp = wp.at[:fan_in, :fan_out].set(w.astype(jnp.bfloat16))
            bp = jnp.zeros((1, self.dims_p[l + 1]), jnp.float32)
            bp = bp.at[0, :fan_out].set(b)
            self.w_pad.append(wp)
            self.b_pad.append(bp)

    @staticmethod
    def normalized_adjacency(edge_index, n_nodes):
        """edge_index [2, E] -> D^{-1/2} (A + I) D^{-1/2}, dense [N, N] f32."""
        src, dst = edge_index[0], edge_index[1]
        a = jnp.zeros((n_nodes, n_nodes), jnp.float32)
        a = a.at[src, dst].set(1.0)
        a = jnp.maximum(a, a.T)                                  # symmetrize
        a = jnp.maximum(a, jnp.eye(n_nodes, dtype=jnp.float32))  # self loops, diag==1
        deg = a.sum(axis=1)
        d_inv_sqrt = jnp.where(deg > 0, 1.0 / jnp.sqrt(deg), 0.0)
        return a * d_inv_sqrt[:, None] * d_inv_sqrt[None, :]

    def _get_padded_adjacency(self, edge_index, n_p):
        key = id(edge_index)  # identity-based cache: rebuild only for a new graph
        if (self._a_cache is not None and self._a_cache_key == key
                and self._a_cache.shape[0] == n_p):
            return self._a_cache
        a = self.normalized_adjacency(edge_index, self.n_nodes)
        a_p = jnp.zeros((n_p, n_p), jnp.bfloat16)
        a_p = a_p.at[:self.n_nodes, :self.n_nodes].set(a.astype(jnp.bfloat16))
        a_p = jax.block_until_ready(a_p)
        self._a_cache, self._a_cache_key = a_p, key
        return a_p

    def _fused_vmem_bytes(self, n_p):
        """VMEM footprint estimate for the grid-less fused kernel, including the
        in-kernel f32/bf16 temporaries (a grid-less call does not double-buffer)."""
        max_w = max(self.dims_p)
        inputs = (n_p * n_p * 2 + n_p * self.dims_p[0] * 2
                  + sum(w.size * 2 + b.size * 4
                        for w, b in zip(self.w_pad, self.b_pad)))
        out = n_p * self.dims_p[-1] * 4
        temps = n_p * max_w * (4 + 2 + 2)   # f32 layer out + bf16 z/s + bf16 next h
        return int(1.15 * (inputs + out + temps))

    def forward(self, x, edge_index, *, force_tiled=False, max_bm=None, max_bk=None):
        """x: [n_nodes, in_feats] f32, edge_index: [2, E] int32 -> [n_nodes, classes]."""
        n = self.n_nodes
        n_p = _round_up(n, LANE)                     # pad rows only to the 128 lane size
        budget = self._vmem_budget

        a_p = self._get_padded_adjacency(edge_index, n_p)
        h_p = jnp.zeros((n_p, self.dims_p[0]), jnp.bfloat16)
        h_p = h_p.at[:n, :self.in_feats].set(x.astype(jnp.bfloat16))

        if (not force_tiled) and self._fused_vmem_bytes(n_p) <= self._fused_threshold:
            # Small-graph fast path: A_hat DMA'd into VMEM exactly once for all layers.
            out_p = _fused_forward(a_p, h_p, self.w_pad, self.b_pad, budget)
        else:
            out_p = h_p
            for l in range(self.n_layers):
                last = l == self.n_layers - 1
                out_dtype = jnp.float32 if last else jnp.bfloat16
                din_p, dout_p = self.w_pad[l].shape
                if _hw_first(din_p, dout_p):
                    # A @ (H @ W): small pre-transform, then aggregation on Z.
                    zb = jnp.zeros((1, dout_p), jnp.float32)
                    z = transform(out_p, self.w_pad[l], zb, apply_relu=False,
                                  out_dtype=jnp.bfloat16, budget=budget)
                    out_p = gcn_layer(a_p, z, self.b_pad[l], fuse_w=False,
                                      apply_relu=not last, out_dtype=out_dtype,
                                      budget=budget, max_bm=max_bm, max_bk=max_bk)
                else:
                    # (A @ H) @ W fully fused into one kernel (W epilogue).
                    out_p = gcn_layer(a_p, out_p, self.b_pad[l], self.w_pad[l],
                                      fuse_w=True, apply_relu=not last,
                                      out_dtype=out_dtype, budget=budget,
                                      max_bm=max_bm, max_bk=max_bk)
            # dropout (eval mode) == identity
        return out_p[:n, :self.number_classes].astype(jnp.float32)

    def reference_forward(self, x, edge_index):
        """Pure-JAX f32 reference of the same math (for self-checking)."""
        a = self.normalized_adjacency(edge_index, self.n_nodes)
        h = x.astype(jnp.float32)
        for l in range(self.n_layers):
            h = a @ (h @ self.weights_f32[l]) + self.biases_f32[l]
            if l < self.n_layers - 1:
                h = jnp.maximum(h, 0.0)
        return h


# --------------------------------- main ---------------------------------------

if __name__ == "__main__":
    key = jax.random.PRNGKey(0)

    def rel_err(out, ref):
        return float(jnp.max(jnp.abs(out - ref)) / (jnp.max(jnp.abs(ref)) + 1e-6))

    # --- 1. small demo matching the module's config (fused VMEM-resident path) ---
    n_layers, n_nodes, in_feats, hidden, classes, dropout = 3, 16, 8, 32, 4, 0.5
    key, k_model, k_x, k_e = jax.random.split(key, 4)
    model = PallasGCN(n_layers, n_nodes, in_feats, hidden, classes, dropout, k_model)
    x = jax.random.normal(k_x, (n_nodes, in_feats), jnp.float32)
    edge_index = jax.random.randint(k_e, (2, 48), 0, n_nodes, jnp.int32)

    out = jax.block_until_ready(model.forward(x, edge_index))
    ref = model.reference_forward(x, edge_index)
    assert out.shape == (n_nodes, classes), out.shape
    assert out.dtype == jnp.float32
    assert bool(jnp.all(jnp.isfinite(out)))
    assert rel_err(out, ref) < 0.06, f"fused path mismatch: {rel_err(out, ref)}"

    # --- 2. tiled grid path with forced small tiles (multi-block row + k
    #        accumulation, fused-W epilogue) ---
    n2, hidden2 = 200, 160
    key, k_m2, k_x2, k_e2 = jax.random.split(key, 4)
    model2 = PallasGCN(3, n2, in_feats, hidden2, classes, dropout, k_m2)
    x2 = jax.random.normal(k_x2, (n2, in_feats), jnp.float32)
    e2 = jax.random.randint(k_e2, (2, 800), 0, n2, jnp.int32)
    out2 = jax.block_until_ready(
        model2.forward(x2, e2, force_tiled=True, max_bm=128, max_bk=128))
    ref2 = model2.reference_forward(x2, e2)
    assert out2.shape == (n2, classes), out2.shape
    assert bool(jnp.all(jnp.isfinite(out2)))
    assert rel_err(out2, ref2) < 0.06, f"tiled path mismatch: {rel_err(out2, ref2)}"

    # --- 3. wide-input graph: exercises the H@W-first order (transform + aggregate)
    #        for layer 0 and the fused (A@H)@W order for the rest, auto tiles ---
    n3, in3, hid3 = 384, 600, 256
    key, k_m3, k_x3, k_e3 = jax.random.split(key, 4)
    model3 = PallasGCN(2, n3, in3, hid3, classes, dropout, k_m3)
    x3 = jax.random.normal(k_x3, (n3, in3), jnp.float32)
    e3 = jax.random.randint(k_e3, (2, 1500), 0, n3, jnp.int32)
    out3 = jax.block_until_ready(model3.forward(x3, e3, force_tiled=True))
    ref3 = model3.reference_forward(x3, e3)
    assert out3.shape == (n3, classes), out3.shape
    assert bool(jnp.all(jnp.isfinite(out3)))
    assert rel_err(out3, ref3) < 0.08, f"HW-first path mismatch: {rel_err(out3, ref3)}"

    print("KERNEL_OK")
</pallas_src>

<mosaic_0001>
module attributes {stable_mosaic.version = 11 : i64} {
  func.func @_fused_gcn_kernel(%arg0: memref<128x128xbf16, #tpu.memory_space<vmem>>, %arg1: memref<128x128xbf16, #tpu.memory_space<vmem>>, %arg2: memref<128x128xbf16, #tpu.memory_space<vmem>>, %arg3: memref<1x128xf32, #tpu.memory_space<vmem>>, %arg4: memref<128x128xbf16, #tpu.memory_space<vmem>>, %arg5: memref<1x128xf32, #tpu.memory_space<vmem>>, %arg6: memref<128x128xbf16, #tpu.memory_space<vmem>>, %arg7: memref<1x128xf32, #tpu.memory_space<vmem>>, %arg8: memref<128x128xf32, #tpu.memory_space<vmem>>) attributes {dimension_semantics = [], scalar_prefetch = 0 : i64, scratch_operands = 0 : i64, tpu.core_type = #tpu.core_type<tc>} {
    %c0 = arith.constant 0 : index
    %c0_0 = arith.constant 0 : index
    %0 = vector.load %arg0[%c0, %c0_0] : memref<128x128xbf16, #tpu.memory_space<vmem>>, vector<128x128xbf16>
    %c0_1 = arith.constant 0 : index
    %c0_2 = arith.constant 0 : index
    %1 = vector.load %arg1[%c0_1, %c0_2] : memref<128x128xbf16, #tpu.memory_space<vmem>>, vector<128x128xbf16>
    %c0_3 = arith.constant 0 : index
    %c0_4 = arith.constant 0 : index
    %2 = vector.load %arg2[%c0_3, %c0_4] : memref<128x128xbf16, #tpu.memory_space<vmem>>, vector<128x128xbf16>
    %c0_5 = arith.constant 0 : index
    %c0_6 = arith.constant 0 : index
    %3 = vector.load %arg3[%c0_5, %c0_6] : memref<1x128xf32, #tpu.memory_space<vmem>>, vector<1x128xf32>
    %cst = arith.constant dense<0.000000e+00> : vector<128x128xf32>
    %4 = tpu.matmul %0, %1, %cst {dimension_numbers = #tpu.dot_dimension_numbers<[1], [0], [0], [1], [0, 0, 1, 1], [], []>} : vector<128x128xbf16>, vector<128x128xbf16>, vector<128x128xf32> -> vector<128x128xf32>
    %5 = arith.truncf %4 : vector<128x128xf32> to vector<128x128xbf16>
    %cst_7 = arith.constant dense<0.000000e+00> : vector<128x128xf32>
    %6 = tpu.matmul %5, %2, %cst_7 {dimension_numbers = #tpu.dot_dimension_numbers<[1], [0], [0], [1], [0, 0, 1, 1], [], []>} : vector<128x128xbf16>, vector<128x128xbf16>, vector<128x128xf32> -> vector<128x128xf32>
    %7 = vector.broadcast %3 : vector<1x128xf32> to vector<128x128xf32>
    %8 = arith.addf %6, %7 : vector<128x128xf32>
    %cst_8 = arith.constant 0.000000e+00 : f32
    %9 = vector.broadcast %cst_8 : f32 to vector<128x128xf32>
    %10 = arith.maximumf %8, %9 : vector<128x128xf32>
    %11 = arith.truncf %10 : vector<128x128xf32> to vector<128x128xbf16>
    %c0_9 = arith.constant 0 : index
    %c0_10 = arith.constant 0 : index
    %12 = vector.load %arg4[%c0_9, %c0_10] : memref<128x128xbf16, #tpu.memory_space<vmem>>, vector<128x128xbf16>
    %c0_11 = arith.constant 0 : index
    %c0_12 = arith.constant 0 : index
    %13 = vector.load %arg5[%c0_11, %c0_12] : memref<1x128xf32, #tpu.memory_space<vmem>>, vector<1x128xf32>
    %cst_13 = arith.constant dense<0.000000e+00> : vector<128x128xf32>
    %14 = tpu.matmul %0, %11, %cst_13 {dimension_numbers = #tpu.dot_dimension_numbers<[1], [0], [0], [1], [0, 0, 1, 1], [], []>} : vector<128x128xbf16>, vector<128x128xbf16>, vector<128x128xf32> -> vector<128x128xf32>
    %15 = arith.truncf %14 : vector<128x128xf32> to vector<128x128xbf16>
    %cst_14 = arith.constant dense<0.000000e+00> : vector<128x128xf32>
    %16 = tpu.matmul %15, %12, %cst_14 {dimension_numbers = #tpu.dot_dimension_numbers<[1], [0], [0], [1], [0, 0, 1, 1], [], []>} : vector<128x128xbf16>, vector<128x128xbf16>, vector<128x128xf32> -> vector<128x128xf32>
    %17 = vector.broadcast %13 : vector<1x128xf32> to vector<128x128xf32>
    %18 = arith.addf %16, %17 : vector<128x128xf32>
    %cst_15 = arith.constant 0.000000e+00 : f32
    %19 = vector.broadcast %cst_15 : f32 to vector<128x128xf32>
    %20 = arith.maximumf %18, %19 : vector<128x128xf32>
    %21 = arith.truncf %20 : vector<128x128xf32> to vector<128x128xbf16>
    %c0_16 = arith.constant 0 : index
    %c0_17 = arith.constant 0 : index
    %22 = vector.load %arg6[%c0_16, %c0_17] : memref<128x128xbf16, #tpu.memory_space<vmem>>, vector<128x128xbf16>
    %c0_18 = arith.constant 0 : index
    %c0_19 = arith.constant 0 : index
    %23 = vector.load %arg7[%c0_18, %c0_19] : memref<1x128xf32, #tpu.memory_space<vmem>>, vector<1x128xf32>
    %cst_20 = arith.constant dense<0.000000e+00> : vector<128x128xf32>
    %24 = tpu.matmul %0, %21, %cst_20 {dimension_numbers = #tpu.dot_dimension_numbers<[1], [0], [0], [1], [0, 0, 1, 1], [], []>} : vector<128x128xbf16>, vector<128x128xbf16>, vector<128x128xf32> -> vector<128x128xf32>
    %25 = arith.truncf %24 : vector<128x128xf32> to vector<128x128xbf16>
    %cst_21 = arith.constant dense<0.000000e+00> : vector<128x128xf32>
    %26 = tpu.matmul %25, %22, %cst_21 {dimension_numbers = #tpu.dot_dimension_numbers<[1], [0], [0], [1], [0, 0, 1, 1], [], []>} : vector<128x128xbf16>, vector<128x128xbf16>, vector<128x128xf32> -> vector<128x128xf32>
    %27 = vector.broadcast %23 : vector<1x128xf32> to vector<128x128xf32>
    %28 = arith.addf %26, %27 : vector<128x128xf32>
    %c0_22 = arith.constant 0 : index
    %c0_23 = arith.constant 0 : index
    %29 = vector.load %arg8[%c0_22, %c0_23] : memref<128x128xf32, #tpu.memory_space<vmem>>, vector<128x128xf32>
    tpu.vector_store %arg8[%c0_22, %c0_23], %28 {strides = array<i32>} : memref<128x128xf32, #tpu.memory_space<vmem>>, vector<128x128xf32>,
    return
  }
}

</mosaic_0001>

<bundles_post_ra>
// kernel: tpu_custom_call.1
= control target key start
LH: loop header
LB: loop body
LE: loop exit
PB: predicated region body
PF: predicated region fallthrough
CT: control target
= control target key end

     0   :  { %13 = vsyncpa [#allocation3], 0  ;;  %s1855_s0 = inlined_call_operand.hbm [shape: bf16[128,128], index: 0, kind: input, shape index: {}]   ;;  %s1856_s1 = inlined_call_operand.hbm [shape: bf16[128,128], index: 1, kind: input, shape index: {}]   ;;  %s1857_s2 = inlined_call_operand.hbm [shape: bf16[128,128], index: 2, kind: input, shape index: {}]   ;;  %s1858_s3 = inlined_call_operand.vmem [shape: f32[1,128], index: 3, kind: input, shape index: {}]   ;;  %s1859_s4 = inlined_call_operand.hbm [shape: bf16[128,128], index: 4, kind: input, shape index: {}]   ;;  %s1860_s5 = inlined_call_operand.vmem [shape: f32[1,128], index: 5, kind: input, shape index: {}]   ;;  %s1861_s6 = inlined_call_operand.hbm [shape: bf16[128,128], index: 6, kind: input, shape index: {}]   ;;  %s1862_s7 = inlined_call_operand.vmem [shape: f32[1,128], index: 7, kind: input, shape index: {}]   ;;  %s1863_s8 = inlined_call_operand.hbm [shape: f32[128,128], index: 8, kind: output, shape index: {}]  }
   0x1   :  { %14 = vsyncpa [#allocation6], 0 }
   0x2   :  { %15 = vsyncpa [#allocation9], 0 }
   0x3   :  { %16 = vsyncpa [#allocation4], 0  ;;  %s1650_s27 = smov [#allocation5]   ;;  %s1651_s29 = smov [#allocation8]  }
   0x4   :  { %s34_s28 = sshll.u32 %s1650_s27, 4  ;;  %s60_s30 = sshll.u32 %s1651_s29, 4  ;;  %s35_s28 = int_to_ptr.vmem [resolvable:$true] %s34_s28  ;;  %s1705_s30 = int_to_ptr.vmem [resolvable:$true] %s60_s30 }
   0x5   :  { %s1510_s11 = scalar_lea.hbm %s1856_s1, 1024 }
   0x6   :  { %p1511_p0 = scmp.ne.s32.totalorder %s1856_s1, %s1510_s11  ;;  %p1514_p1 = scmp.lt.u32.totalorder %s1510_s11, %s1856_s1 }
   0x8   :  { %p1516_p2 = pnand %p1514_p1, %p1511_p0 }
   0xa   :  { %1519 = shalt.err (!%p1516_p2)
}
   0xb   :  { %s1520_s16 = scalar_lea.vmem %s35_s28, 1024  ;;  %p1525_p4 = scmp.lt.s32.totalorder %s35_s28, %s35_s28 }
   0xc   :  { %p1521_p3 = scmp.ne.s32.totalorder %s35_s28, %s1520_s16  ;;  %p1526_p5 = scmp.lt.s32.totalorder %s1520_s16, %s1520_s16 }
   0xe   :  { %p1527_p6 = por %p1526_p5, %p1525_p4 }
  0x10   :  { %p1528_p7 = pnand %p1527_p6, %p1521_p3 }
  0x12   :  { %1531 = shalt.err (!%p1528_p7)
}
  0x13   :  { %s1652_s17 = smov 64   ;;  %s1653_s18 = smov 4  }
  0x14   :  { %40 = dma.hbm_to_vmem [thread:$0]  %s1856_s1, 1024, %s35_s28, [#allocation6], %s1652_s17, %s1652_s17, %s1653_s18  }
  0x15   :  { %s1532_s23 = scalar_lea.hbm %s1859_s4, 1024 }
  0x16   :  { %p1533_p8 = scmp.ne.s32.totalorder %s1859_s4, %s1532_s23  ;;  %p1536_p9 = scmp.lt.u32.totalorder %s1532_s23, %s1859_s4 }
  0x18   :  { %p1538_p10 = pnand %p1536_p9, %p1533_p8 }
  0x1a   :  { %1541 = shalt.err (!%p1538_p10)
}
  0x1b   :  { %s1542_s29 = scalar_lea.vmem %s1705_s30, 1024  ;;  %p1547_p12 = scmp.lt.s32.totalorder %s1705_s30, %s1705_s30 }
  0x1c   :  { %p1543_p11 = scmp.ne.s32.totalorder %s1705_s30, %s1542_s29  ;;  %p1548_p13 = scmp.lt.s32.totalorder %s1542_s29, %s1542_s29 }
  0x1e   :  { %p1549_p0 = por %p1548_p13, %p1547_p12 }
  0x20   :  { %p1550_p1 = pnand %p1549_p0, %p1543_p11 }
  0x22   :  { %1553 = shalt.err (!%p1550_p1)
}
  0x23   :  { %66 = dma.hbm_to_vmem [thread:$0]  %s1859_s4, 1024, %s1705_s30, [#allocation9], %s1652_s17, %s1652_s17, %s1653_s18  }
  0x24   :  { %s1654_s9 = smov [#allocation2]   ;;  %s1655_s11 = smov [#allocation7]  }
  0x25   :  { %s22_s10 = sshll.u32 %s1654_s9, 4  ;;  %s46_s12 = sshll.u32 %s1655_s11, 4  ;;  %s23_s10 = int_to_ptr.vmem [resolvable:$true] %s22_s10  ;;  %s1742_s12 = int_to_ptr.vmem [resolvable:$true] %s46_s12 }
  0x26   :  { %s1554_s15 = scalar_lea.hbm %s1855_s0, 1024 }
  0x27   :  { %p1555_p2 = scmp.ne.s32.totalorder %s1855_s0, %s1554_s15  ;;  %p1558_p3 = scmp.lt.u32.totalorder %s1554_s15, %s1855_s0 }
  0x29   :  { %p1560_p4 = pnand %p1558_p3, %p1555_p2 }
  0x2b   :  { %1563 = shalt.err (!%p1560_p4)
}
  0x2c   :  { %s1564_s4 = scalar_lea.vmem %s23_s10, 1024  ;;  %p1569_p6 = scmp.lt.s32.totalorder %s23_s10, %s23_s10 }
  0x2d   :  { %p1565_p5 = scmp.ne.s32.totalorder %s23_s10, %s1564_s4  ;;  %p1570_p7 = scmp.lt.s32.totalorder %s1564_s4, %s1564_s4 }
  0x2f   :  { %p1571_p8 = por %p1570_p7, %p1569_p6 }
  0x31   :  { %p1572_p9 = pnand %p1571_p8, %p1565_p5 }
  0x33   :  { %1575 = shalt.err (!%p1572_p9)
}
  0x34   :  { %28 = dma.hbm_to_vmem [thread:$0]  %s1855_s0, 1024, %s23_s10, [#allocation3], %s1652_s17, %s1652_s17, %s1653_s18  }
  0x35   :  { %s1576_s25 = scalar_lea.hbm %s1857_s2, 1024 }
  0x36   :  { %p1577_p10 = scmp.ne.s32.totalorder %s1857_s2, %s1576_s25  ;;  %p1580_p11 = scmp.lt.u32.totalorder %s1576_s25, %s1857_s2 }
  0x38   :  { %p1582_p12 = pnand %p1580_p11, %p1577_p10 }
  0x3a   :  { %1585 = shalt.err (!%p1582_p12)
}
  0x3b   :  { %s1586_s28 = scalar_lea.vmem %s1742_s12, 1024  ;;  %p1591_p0 = scmp.lt.s32.totalorder %s1742_s12, %s1742_s12 }
  0x3c   :  { %p1587_p13 = scmp.ne.s32.totalorder %s1742_s12, %s1586_s28  ;;  %p1592_p1 = scmp.lt.s32.totalorder %s1586_s28, %s1586_s28 }
  0x3e   :  { %p1593_p2 = por %p1592_p1, %p1591_p0 }
  0x40   :  { %p1594_p3 = pnand %p1593_p2, %p1587_p13 }
  0x42   :  { %1597 = shalt.err (!%p1594_p3)
}
  0x43   :  { %52 = dma.hbm_to_vmem [thread:$0]  %s1857_s2, 1024, %s1742_s12, [#allocation6], %s1652_s17, %s1652_s17, %s1653_s18  }
  0x44   :  { %s1656_s10 = smov [#allocation10]   ;;  %s1598_s15 = scalar_lea.hbm %s1861_s6, 1024 }
  0x45   :  { %s74_s11 = sshll.u32 %s1656_s10, 4  ;;  %p1599_p4 = scmp.ne.s32.totalorder %s1861_s6, %s1598_s15  ;;  %s75_s11 = int_to_ptr.vmem [resolvable:$true] %s74_s11 }
  0x46   :  { %p1602_p5 = scmp.lt.u32.totalorder %s1598_s15, %s1861_s6 }
  0x48   :  { %p1604_p6 = pnand %p1602_p5, %p1599_p4 }
  0x4a   :  { %1607 = shalt.err (!%p1604_p6)
}
  0x4b   :  { %s1608_s4 = scalar_lea.vmem %s75_s11, 1024  ;;  %p1613_p8 = scmp.lt.s32.totalorder %s75_s11, %s75_s11 }
  0x4c   :  { %p1609_p7 = scmp.ne.s32.totalorder %s75_s11, %s1608_s4  ;;  %p1614_p9 = scmp.lt.s32.totalorder %s1608_s4, %s1608_s4 }
  0x4e   :  { %p1615_p10 = por %p1614_p9, %p1613_p8 }
  0x50   :  { %p1616_p11 = pnand %p1615_p10, %p1609_p7 }
  0x52   :  { %1619 = shalt.err (!%p1616_p11)
}
  0x53   :  { %80 = dma.hbm_to_vmem [thread:$0]  %s1861_s6, 1024, %s75_s11, [#allocation9], %s1652_s17, %s1652_s17, %s1653_s18  }
  0x54   :  { %1642 = dma.done.wait [#allocation3], 1024  }
  0x55   :  { %1643 = vsyncadd [#allocation3], 4294966272 }
  0x56   :  { %1644 = dma.done.wait [#allocation6], 2048  }
  0x57   :  { %1645 = vsyncadd [#allocation6], 4294965248 }
  0x58   :  { %1646 = dma.done.wait [#allocation9], 2048  }
  0x59   :  { %1647 = vsyncadd [#allocation9], 4294965248  ;;  %v1470_v0 = vld [vmem:[#allocation5] sm:$0xff]   ;;  %v1471_v1 = vld [vmem:[#allocation5 + $0x8] sm:$0xff]  }
  0x5a   :  { %1268 = vmatprep.subr.bf16.mxu0 %v1470_v0  ;;  %v1472_v2 = vld [vmem:[#allocation5 + $0x10] sm:$0xff]   ;;  %v1473_v3 = vld [vmem:[#allocation5 + $0x18] sm:$0xff]   ;;  %v1794_v4 = vld [vmem:[#allocation2] sm:$0xff]  }
  0x5b   :  { %1269 = vmatpush3.bf16.msra.mxu0 %v1470_v0  ;;  %1284 = vmatprep.mubr.bf16.mxu0 %v1794_v4  ;;  %v1474_v5 = vld [vmem:[#allocation5 + $0x20] sm:$0xff]   ;;  %v1475_v6 = vld [vmem:[#allocation5 + $0x28] sm:$0xff]   ;;  %v1476_v9 = vld [vmem:[#allocation5 + $0x30] sm:$0xff]  }
  0x5c   :  { %1270 = vmatprep.subr.bf16.mxu0 %v1471_v1  ;;  %v1486_v7 = vld [vmem:[#allocation7] sm:$0xff]   ;;  %v1487_v8 = vld [vmem:[#allocation7 + $0x8] sm:$0xff]   ;;  %v1488_v10 = vld [vmem:[#allocation7 + $0x10] sm:$0xff]  }
  0x5d   :  { %1300 = vmatprep.subr.bf16.mxu1 %v1486_v7  ;;  %v1477_v11 = vld [vmem:[#allocation5 + $0x38] sm:$0xff]   ;;  %v1490_v13 = vld [vmem:[#allocation7 + $0x20] sm:$0xff]   ;;  %v1797_v14 = vld [vmem:[#allocation2 + $0x8] sm:$0xff]  }
  0x5e   :  { %1301 = vmatpush3.bf16.msra.mxu1 %v1486_v7  ;;  %v1489_v12 = vld [vmem:[#allocation7 + $0x18] sm:$0xff]   ;;  %v1799_v15 = vld [vmem:[#allocation2 + $0x10] sm:$0xff]   ;;  %v1491_v16 = vld [vmem:[#allocation7 + $0x28] sm:$0xff]  }
  0x5f   :  { %1271 = vmatpush3.bf16.msra.mxu0 %v1471_v1  ;;  %1302 = vmatprep.subr.bf16.mxu1 %v1487_v8  ;;  %v1492_v17 = vld [vmem:[#allocation7 + $0x30] sm:$0xff]   ;;  %v1803_v18 = vld [vmem:[#allocation2 + $0x18] sm:$0xff]   ;;  %v1805_v19 = vld [vmem:[#allocation2 + $0x20] sm:$0xff]  }
  0x60   :  { %1272 = vmatprep.subr.bf16.mxu0 %v1472_v2  ;;  %v1809_v20 = vld [vmem:[#allocation2 + $0x28] sm:$0xff]   ;;  %v1811_v21 = vld [vmem:[#allocation2 + $0x30] sm:$0xff]   ;;  %v1815_v22 = vld [vmem:[#allocation2 + $0x38] sm:$0xff]  }
  0x61   :  { %v1493_v23 = vld [vmem:[#allocation7 + $0x38] sm:$0xff]   ;;  %v1494_v48 = vld [vmem:[#allocation8] sm:$0xff]   ;;  %v1495_v49 = vld [vmem:[#allocation8 + $0x8] sm:$0xff]  }
  0x62   :  { %1303 = vmatpush3.bf16.msra.mxu1 %v1487_v8  ;;  %v1496_v50 = vld [vmem:[#allocation8 + $0x10] sm:$0xff]   ;;  %v1497_v51 = vld [vmem:[#allocation8 + $0x18] sm:$0xff]   ;;  %v1498_v52 = vld [vmem:[#allocation8 + $0x20] sm:$0xff]  }
  0x63   :  { %1273 = vmatpush3.bf16.msra.mxu0 %v1472_v2  ;;  %1304 = vmatprep.subr.bf16.mxu1 %v1488_v10  ;;  %v1499_v53 = vld [vmem:[#allocation8 + $0x28] sm:$0xff]   ;;  %v1500_v54 = vld [vmem:[#allocation8 + $0x30] sm:$0xff]   ;;  %v1145_v55 = vld [vmem:[%s1858_s3] ss:$0 sm:$0xff] }
  0x64   :  { %1274 = vmatprep.subr.bf16.mxu0 %v1473_v3 }
  0x66   :  { %1305 = vmatpush3.bf16.msra.mxu1 %v1488_v10 }
  0x67   :  { %1275 = vmatpush3.bf16.msra.mxu0 %v1473_v3  ;;  %1306 = vmatprep.subr.bf16.mxu1 %v1489_v12 }
  0x68   :  { %1276 = vmatprep.subr.bf16.mxu0 %v1474_v5 }
  0x6a   :  { %1307 = vmatpush3.bf16.msra.mxu1 %v1489_v12 }
  0x6b   :  { %1277 = vmatpush3.bf16.msra.mxu0 %v1474_v5  ;;  %1308 = vmatprep.subr.bf16.mxu1 %v1490_v13 }
  0x6c   :  { %1278 = vmatprep.subr.bf16.mxu0 %v1475_v6 }
  0x6e   :  { %1309 = vmatpush3.bf16.msra.mxu1 %v1490_v13 }
  0x6f   :  { %1279 = vmatpush3.bf16.msra.mxu0 %v1475_v6  ;;  %1310 = vmatprep.subr.bf16.mxu1 %v1491_v16 }
  0x70   :  { %1280 = vmatprep.subr.bf16.mxu0 %v1476_v9 }
  0x72   :  { %1311 = vmatpush3.bf16.msra.mxu1 %v1491_v16 }
  0x73   :  { %1281 = vmatpush3.bf16.msra.mxu0 %v1476_v9  ;;  %1312 = vmatprep.subr.bf16.mxu1 %v1492_v17 }
  0x74   :  { %1282 = vmatprep.subr.bf16.mxu0 %v1477_v11 }
  0x76   :  { %1313 = vmatpush3.bf16.msra.mxu1 %v1492_v17 }
  0x77   :  { %1283 = vmatpush3.bf16.msra.mxu0 %v1477_v11  ;;  %1314 = vmatprep.subr.bf16.mxu1 %v1493_v23 }
  0x7a   :  { %1285 = vmatmul.mubr.bf16.vlgmr.msra.gmra.mrb[0].mxu0 %v1797_v14  ;;  %1315 = vmatpush3.bf16.msra.mxu1 %v1493_v23 }
  0x7b   :  { %1288 = vmatprep.mubr.bf16.mxu0 %v1799_v15  ;;  %1364 = vmatprep.subr.bf16.mxu1 %v1494_v48 }
  0x82   :  { %1289 = vmatmul.mubr.bf16.gmra.mrb[4].mxu0 %v1803_v18 }
  0x83   :  { %1292 = vmatprep.mubr.bf16.mxu0 %v1805_v19 }
  0x8a   :  { %1293 = vmatmul.mubr.bf16.gmra.mrb[8].mxu0 %v1809_v20 }
  0x8b   :  { %1296 = vmatprep.mubr.bf16.mxu0 %v1811_v21 }
  0x92   :  { %1297 = vmatmul.mubr.bf16.gmra.mrb[12].mxu0 %v1815_v22 }
  0x93   :  { %1348 = vmatprep.mubr.bf16.mxu0 %v1794_v4 }
 0x14d   :  { %v1286_v24 = vpop.f32.mrb[0].mxu0 }
 0x14e   :  { %v278_v25 = vpop.f32.mrb[1].mxu0 }
 0x14f   :  { %v1287_v26 = vpop.f32.mrb[2].mxu0 }
 0x150   :  { %v342_v27 = vpack.c.bf16 %v1287_v26, %v1286_v24  ;;  %v281_v28 = vpop.f32.mrb[3].mxu0 }
 0x151   :  { %v341_v29 = vpack.c.bf16 %v281_v28, %v278_v25 }
 0x153   :  { %1316 = vmatprep.mubr.bf16.mxu1 %v341_v29 }
 0x154   :  { %1317 = vmatmul.mubr.bf16.vlgmr.msra.gmra.mrb[0].mxu1 %v342_v27 }
 0x155   :  { %v1290_v30 = vpop.f32.mrb[4].mxu0  ;;  %1365 = vmatpush3.bf16.msra.mxu1 %v1494_v48 }
 0x156   :  { %v294_v31 = vpop.f32.mrb[5].mxu0  ;;  %1366 = vmatprep.subr.bf16.mxu1 %v1495_v49 }
 0x157   :  { %v1291_v32 = vpop.f32.mrb[6].mxu0 }
 0x158   :  { %v344_v33 = vpack.c.bf16 %v1291_v32, %v1290_v30  ;;  %v297_v34 = vpop.f32.mrb[7].mxu0 }
 0x159   :  { %v343_v35 = vpack.c.bf16 %v297_v34, %v294_v31  ;;  %1367 = vmatpush3.bf16.msra.mxu1 %v1495_v49 }
 0x15a   :  { %1368 = vmatprep.subr.bf16.mxu1 %v1496_v50 }
 0x15b   :  { %1320 = vmatprep.mubr.bf16.mxu1 %v343_v35 }
 0x15c   :  { %1321 = vmatmul.mubr.bf16.gmra.mrb[4].mxu1 %v344_v33 }
 0x15d   :  { %v1294_v36 = vpop.f32.mrb[8].mxu0  ;;  %1369 = vmatpush3.bf16.msra.mxu1 %v1496_v50 }
 0x15e   :  { %v310_v37 = vpop.f32.mrb[9].mxu0  ;;  %1370 = vmatprep.subr.bf16.mxu1 %v1497_v51 }
 0x15f   :  { %v1295_v38 = vpop.f32.mrb[10].mxu0 }
 0x160   :  { %v346_v39 = vpack.c.bf16 %v1295_v38, %v1294_v36  ;;  %v313_v40 = vpop.f32.mrb[11].mxu0 }
 0x161   :  { %v345_v41 = vpack.c.bf16 %v313_v40, %v310_v37  ;;  %1371 = vmatpush3.bf16.msra.mxu1 %v1497_v51 }
 0x162   :  { %1372 = vmatprep.subr.bf16.mxu1 %v1498_v52 }
 0x163   :  { %1324 = vmatprep.mubr.bf16.mxu1 %v345_v41 }
 0x164   :  { %1325 = vmatmul.mubr.bf16.gmra.mrb[8].mxu1 %v346_v39 }
 0x165   :  { %v1298_v42 = vpop.f32.mrb[12].mxu0  ;;  %1373 = vmatpush3.bf16.msra.mxu1 %v1498_v52 }
 0x166   :  { %v326_v43 = vpop.f32.mrb[13].mxu0  ;;  %1374 = vmatprep.subr.bf16.mxu1 %v1499_v53 }
 0x167   :  { %v1299_v44 = vpop.f32.mrb[14].mxu0 }
 0x168   :  { %v348_v45 = vpack.c.bf16 %v1299_v44, %v1298_v42  ;;  %v329_v46 = vpop.f32.mrb[15].mxu0 }
 0x169   :  { %v347_v47 = vpack.c.bf16 %v329_v46, %v326_v43  ;;  %1375 = vmatpush3.bf16.msra.mxu1 %v1499_v53 }
 0x16a   :  { %1376 = vmatprep.subr.bf16.mxu1 %v1500_v54 }
 0x16b   :  { %1328 = vmatprep.mubr.bf16.mxu1 %v347_v47 }
 0x16c   :  { %1329 = vmatmul.mubr.bf16.gmra.mrb[12].mxu1 %v348_v45 }
 0x16d   :  { %1377 = vmatpush3.bf16.msra.mxu1 %v1500_v54 }
 0x227   :  { %v1318_v56 = vpop.f32.mrb[0].mxu1 }
 0x228   :  { %v446_v57 = vadd.f32 %v1318_v56, %v1145_v55  ;;  %v437_v58 = vpop.f32.mrb[1].mxu1 }
 0x229   :  { %v438_v59 = vadd.f32 %v1145_v55, %v437_v58  ;;  %v1319_v60 = vpop.f32.mrb[2].mxu1 }
 0x22a   :  { %v449_v61 = vadd.f32 %v1319_v60, %v1145_v55  ;;  %v440_v62 = vpop.f32.mrb[3].mxu1  ;;  %v502_v0 = vmax.f32 %v446_v57, 0.0 }
 0x22b   :  { %v441_v63 = vadd.f32 %v1145_v55, %v440_v62  ;;  %v500_v2 = vmax.f32 %v438_v59, 0.0 }
 0x22c   :  { %v503_v1 = vmax.f32 %v449_v61, 0.0 }
 0x22d   :  { %v501_v3 = vmax.f32 %v441_v63, 0.0 }
 0x22e   :  { %v517_v5 = vpack.c.bf16 %v503_v1, %v502_v0 }
 0x22f   :  { %v516_v6 = vpack.c.bf16 %v501_v3, %v500_v2  ;;  %v1322_v7 = vpop.f32.mrb[4].mxu1 }
 0x230   :  { %v462_v8 = vadd.f32 %v1322_v7, %v1145_v55  ;;  %v453_v9 = vpop.f32.mrb[5].mxu1 }
 0x231   :  { %v454_v10 = vadd.f32 %v1145_v55, %v453_v9  ;;  %v1323_v11 = vpop.f32.mrb[6].mxu1  ;;  %1332 = vmatprep.subr.bf16.mxu0 %v516_v6 }
 0x232   :  { %v465_v12 = vadd.f32 %v1323_v11, %v1145_v55  ;;  %v456_v13 = vpop.f32.mrb[7].mxu1  ;;  %1333 = vmatpush3.bf16.msra.mxu0 %v516_v6  ;;  %v506_v17 = vmax.f32 %v462_v8, 0.0 }
 0x233   :  { %v457_v16 = vadd.f32 %v1145_v55, %v456_v13  ;;  %1334 = vmatprep.subr.bf16.mxu0 %v517_v5  ;;  %v504_v24 = vmax.f32 %v454_v10, 0.0 }
 0x234   :  { %v507_v23 = vmax.f32 %v465_v12, 0.0 }
 0x235   :  { %v505_v25 = vmax.f32 %v457_v16, 0.0 }
 0x236   :  { %v519_v26 = vpack.c.bf16 %v507_v23, %v506_v17  ;;  %1335 = vmatpush3.bf16.msra.mxu0 %v517_v5 }
 0x237   :  { %v518_v27 = vpack.c.bf16 %v505_v25, %v504_v24  ;;  %v1326_v28 = vpop.f32.mrb[8].mxu1  ;;  %v1502_v24 = vld [vmem:[#allocation10] sm:$0xff]   ;;  %v1503_v25 = vld [vmem:[#allocation10 + $0x8] sm:$0xff]  }
 0x238   :  { %v478_v29 = vadd.f32 %v1326_v28, %v1145_v55  ;;  %v469_v30 = vpop.f32.mrb[9].mxu1  ;;  %v1506_v28 = vld [vmem:[#allocation10 + $0x20] sm:$0xff]  }
 0x239   :  { %v470_v31 = vadd.f32 %v1145_v55, %v469_v30  ;;  %v1327_v32 = vpop.f32.mrb[10].mxu1  ;;  %1336 = vmatprep.subr.bf16.mxu0 %v518_v27  ;;  %v1508_v30 = vld [vmem:[#allocation10 + $0x30] sm:$0xff]  }
 0x23a   :  { %v481_v33 = vadd.f32 %v1327_v32, %v1145_v55  ;;  %v472_v34 = vpop.f32.mrb[11].mxu1  ;;  %1337 = vmatpush3.bf16.msra.mxu0 %v518_v27  ;;  %v510_v36 = vmax.f32 %v478_v29, 0.0  ;;  %v1505_v27 = vld [vmem:[#allocation10 + $0x18] sm:$0xff]   ;;  %v1507_v29 = vld [vmem:[#allocation10 + $0x28] sm:$0xff]  }
 0x23b   :  { %v473_v35 = vadd.f32 %v1145_v55, %v472_v34  ;;  %1338 = vmatprep.subr.bf16.mxu0 %v519_v26  ;;  %v508_v38 = vmax.f32 %v470_v31, 0.0  ;;  %v1154_v31 = vld [vmem:[%s1860_s5] ss:$0 sm:$0xff] }
 0x23c   :  { %v511_v37 = vmax.f32 %v481_v33, 0.0 }
 0x23d   :  { %v509_v39 = vmax.f32 %v473_v35, 0.0 }
 0x23e   :  { %v521_v40 = vpack.c.bf16 %v511_v37, %v510_v36  ;;  %1339 = vmatpush3.bf16.msra.mxu0 %v519_v26  ;;  %v1504_v26 = vld [vmem:[#allocation10 + $0x10] sm:$0xff]  }
 0x23f   :  { %v520_v41 = vpack.c.bf16 %v509_v39, %v508_v38  ;;  %v1330_v42 = vpop.f32.mrb[12].mxu1 }
 0x240   :  { %v494_v43 = vadd.f32 %v1330_v42, %v1145_v55  ;;  %v485_v44 = vpop.f32.mrb[13].mxu1 }
 0x241   :  { %v486_v45 = vadd.f32 %v1145_v55, %v485_v44  ;;  %v1331_v46 = vpop.f32.mrb[14].mxu1  ;;  %1340 = vmatprep.subr.bf16.mxu0 %v520_v41 }
 0x242   :  { %v497_v47 = vadd.f32 %v1331_v46, %v1145_v55  ;;  %v488_v48 = vpop.f32.mrb[15].mxu1  ;;  %1341 = vmatpush3.bf16.msra.mxu0 %v520_v41  ;;  %v514_v50 = vmax.f32 %v494_v43, 0.0 }
 0x243   :  { %v489_v49 = vadd.f32 %v1145_v55, %v488_v48  ;;  %1342 = vmatprep.subr.bf16.mxu0 %v521_v40  ;;  %v512_v52 = vmax.f32 %v486_v45, 0.0  ;;  %v1501_v55 = vld [vmem:[#allocation8 + $0x38] sm:$0xff]  }
 0x244   :  { %v515_v51 = vmax.f32 %v497_v47, 0.0  ;;  %1378 = vmatprep.subr.bf16.mxu1 %v1501_v55 }
 0x245   :  { %v513_v53 = vmax.f32 %v489_v49, 0.0  ;;  %1379 = vmatpush3.bf16.msra.mxu1 %v1501_v55 }
 0x246   :  { %v523_v54 = vpack.c.bf16 %v515_v51, %v514_v50  ;;  %1343 = vmatpush3.bf16.msra.mxu0 %v521_v40  ;;  %1428 = vmatprep.subr.bf16.mxu1 %v1502_v24 }
 0x247   :  { %v522_v56 = vpack.c.bf16 %v513_v53, %v512_v52 }
 0x249   :  { %1344 = vmatprep.subr.bf16.mxu0 %v522_v56 }
 0x24a   :  { %1345 = vmatpush3.bf16.msra.mxu0 %v522_v56 }
 0x24b   :  { %1346 = vmatprep.subr.bf16.mxu0 %v523_v54 }
 0x24e   :  { %1347 = vmatpush3.bf16.msra.mxu0 %v523_v54 }
 0x251   :  { %1349 = vmatmul.mubr.bf16.vlgmr.msra.gmra.mrb[16].mxu0 %v1797_v14 }
 0x252   :  { %1352 = vmatprep.mubr.bf16.mxu0 %v1799_v15 }
 0x259   :  { %1353 = vmatmul.mubr.bf16.gmra.mrb[20].mxu0 %v1803_v18 }
 0x25a   :  { %1356 = vmatprep.mubr.bf16.mxu0 %v1805_v19 }
 0x261   :  { %1357 = vmatmul.mubr.bf16.gmra.mrb[24].mxu0 %v1809_v20 }
 0x262   :  { %1360 = vmatprep.mubr.bf16.mxu0 %v1811_v21 }
 0x269   :  { %1361 = vmatmul.mubr.bf16.gmra.mrb[28].mxu0 %v1815_v22 }
 0x26a   :  { %1412 = vmatprep.mubr.bf16.mxu0 %v1794_v4 }
 0x324   :  { %v1350_v57 = vpop.f32.mrb[16].mxu0 }
 0x325   :  { %v575_v58 = vpop.f32.mrb[17].mxu0 }
 0x326   :  { %v1351_v59 = vpop.f32.mrb[18].mxu0 }
 0x327   :  { %v639_v60 = vpack.c.bf16 %v1351_v59, %v1350_v57  ;;  %v578_v61 = vpop.f32.mrb[19].mxu0 }
 0x328   :  { %v638_v62 = vpack.c.bf16 %v578_v61, %v575_v58 }
 0x32a   :  { %1380 = vmatprep.mubr.bf16.mxu1 %v638_v62 }
 0x32b   :  { %1381 = vmatmul.mubr.bf16.vlgmr.msra.gmra.mrb[16].mxu1 %v639_v60 }
 0x32c   :  { %v1354_v63 = vpop.f32.mrb[20].mxu0  ;;  %1429 = vmatpush3.bf16.msra.mxu1 %v1502_v24 }
 0x32d   :  { %v591_v0 = vpop.f32.mrb[21].mxu0  ;;  %1430 = vmatprep.subr.bf16.mxu1 %v1503_v25 }
 0x32e   :  { %v1355_v1 = vpop.f32.mrb[22].mxu0 }
 0x32f   :  { %v641_v2 = vpack.c.bf16 %v1355_v1, %v1354_v63  ;;  %v594_v3 = vpop.f32.mrb[23].mxu0 }
 0x330   :  { %v640_v5 = vpack.c.bf16 %v594_v3, %v591_v0  ;;  %1431 = vmatpush3.bf16.msra.mxu1 %v1503_v25 }
 0x331   :  { %1432 = vmatprep.subr.bf16.mxu1 %v1504_v26 }
 0x332   :  { %1384 = vmatprep.mubr.bf16.mxu1 %v640_v5 }
 0x333   :  { %1385 = vmatmul.mubr.bf16.gmra.mrb[20].mxu1 %v641_v2 }
 0x334   :  { %v1358_v4 = vpop.f32.mrb[24].mxu0  ;;  %1433 = vmatpush3.bf16.msra.mxu1 %v1504_v26 }
 0x335   :  { %v607_v6 = vpop.f32.mrb[25].mxu0  ;;  %1434 = vmatprep.subr.bf16.mxu1 %v1505_v27 }
 0x336   :  { %v1359_v7 = vpop.f32.mrb[26].mxu0 }
 0x337   :  { %v643_v8 = vpack.c.bf16 %v1359_v7, %v1358_v4  ;;  %v610_v9 = vpop.f32.mrb[27].mxu0 }
 0x338   :  { %v642_v10 = vpack.c.bf16 %v610_v9, %v607_v6  ;;  %1435 = vmatpush3.bf16.msra.mxu1 %v1505_v27 }
 0x339   :  { %1436 = vmatprep.subr.bf16.mxu1 %v1506_v28 }
 0x33a   :  { %1388 = vmatprep.mubr.bf16.mxu1 %v642_v10 }
 0x33b   :  { %1389 = vmatmul.mubr.bf16.gmra.mrb[24].mxu1 %v643_v8 }
 0x33c   :  { %v1362_v11 = vpop.f32.mrb[28].mxu0  ;;  %1437 = vmatpush3.bf16.msra.mxu1 %v1506_v28 }
 0x33d   :  { %v623_v12 = vpop.f32.mrb[29].mxu0  ;;  %1438 = vmatprep.subr.bf16.mxu1 %v1507_v29 }
 0x33e   :  { %v1363_v13 = vpop.f32.mrb[30].mxu0 }
 0x33f   :  { %v645_v16 = vpack.c.bf16 %v1363_v13, %v1362_v11  ;;  %v626_v17 = vpop.f32.mrb[31].mxu0 }
 0x340   :  { %v644_v23 = vpack.c.bf16 %v626_v17, %v623_v12  ;;  %1439 = vmatpush3.bf16.msra.mxu1 %v1507_v29 }
 0x341   :  { %1440 = vmatprep.subr.bf16.mxu1 %v1508_v30 }
 0x342   :  { %1392 = vmatprep.mubr.bf16.mxu1 %v644_v23 }
 0x343   :  { %1393 = vmatmul.mubr.bf16.gmra.mrb[28].mxu1 %v645_v16 }
 0x344   :  { %1441 = vmatpush3.bf16.msra.mxu1 %v1508_v30 }
 0x3fe   :  { %v1382_v32 = vpop.f32.mrb[16].mxu1 }
 0x3ff   :  { %v743_v33 = vadd.f32 %v1382_v32, %v1154_v31  ;;  %v734_v34 = vpop.f32.mrb[17].mxu1 }
 0x400   :  { %v735_v35 = vadd.f32 %v1154_v31, %v734_v34  ;;  %v1383_v36 = vpop.f32.mrb[18].mxu1 }
 0x401   :  { %v746_v37 = vadd.f32 %v1383_v36, %v1154_v31  ;;  %v737_v38 = vpop.f32.mrb[19].mxu1  ;;  %v799_v40 = vmax.f32 %v743_v33, 0.0 }
 0x402   :  { %v738_v39 = vadd.f32 %v1154_v31, %v737_v38  ;;  %v797_v42 = vmax.f32 %v735_v35, 0.0 }
 0x403   :  { %v800_v41 = vmax.f32 %v746_v37, 0.0 }
 0x404   :  { %v798_v43 = vmax.f32 %v738_v39, 0.0 }
 0x405   :  { %v814_v44 = vpack.c.bf16 %v800_v41, %v799_v40 }
 0x406   :  { %v813_v45 = vpack.c.bf16 %v798_v43, %v797_v42  ;;  %v1386_v46 = vpop.f32.mrb[20].mxu1 }
 0x407   :  { %v759_v47 = vadd.f32 %v1386_v46, %v1154_v31  ;;  %v750_v48 = vpop.f32.mrb[21].mxu1 }
 0x408   :  { %v751_v49 = vadd.f32 %v1154_v31, %v750_v48  ;;  %v1387_v50 = vpop.f32.mrb[22].mxu1  ;;  %1396 = vmatprep.subr.bf16.mxu0 %v813_v45 }
 0x409   :  { %v762_v51 = vadd.f32 %v1387_v50, %v1154_v31  ;;  %v753_v52 = vpop.f32.mrb[23].mxu1  ;;  %1397 = vmatpush3.bf16.msra.mxu0 %v813_v45  ;;  %v803_v54 = vmax.f32 %v759_v47, 0.0 }
 0x40a   :  { %v754_v53 = vadd.f32 %v1154_v31, %v753_v52  ;;  %1398 = vmatprep.subr.bf16.mxu0 %v814_v44  ;;  %v801_v55 = vmax.f32 %v751_v49, 0.0  ;;  %v1163_v49 = vld [vmem:[%s1862_s7] ss:$0 sm:$0xff]  ;;  %s1657_s7 = smov [#allocation11]  }
 0x40b   :  { %v804_v56 = vmax.f32 %v762_v51, 0.0  ;;  %s1115_s22 = sshll.u32 %s1657_s7, 4  ;;  %s1116_s22 = int_to_ptr.vmem [resolvable:$true] %s1115_s22 }
 0x40c   :  { %v802_v57 = vmax.f32 %v754_v53, 0.0  ;;  %s1620_s23 = scalar_lea.vmem %s1116_s22, 2048  ;;  %p1625_p13 = scmp.lt.s32.totalorder %s1116_s22, %s1116_s22 }
 0x40d   :  { %v816_v58 = vpack.c.bf16 %v804_v56, %v803_v54  ;;  %1399 = vmatpush3.bf16.msra.mxu0 %v814_v44  ;;  %p1621_p12 = scmp.ne.s32.totalorder %s1116_s22, %s1620_s23  ;;  %p1626_p0 = scmp.lt.s32.totalorder %s1620_s23, %s1620_s23 }
 0x40e   :  { %v815_v59 = vpack.c.bf16 %v802_v57, %v801_v55  ;;  %v1390_v60 = vpop.f32.mrb[24].mxu1 }
 0x40f   :  { %v775_v61 = vadd.f32 %v1390_v60, %v1154_v31  ;;  %v766_v62 = vpop.f32.mrb[25].mxu1  ;;  %p1627_p1 = por %p1626_p0, %p1625_p13 }
 0x410   :  { %v767_v63 = vadd.f32 %v1154_v31, %v766_v62  ;;  %v1391_v0 = vpop.f32.mrb[26].mxu1  ;;  %1400 = vmatprep.subr.bf16.mxu0 %v815_v59 }
 0x411   :  { %v778_v1 = vadd.f32 %v1391_v0, %v1154_v31  ;;  %v769_v2 = vpop.f32.mrb[27].mxu1  ;;  %1401 = vmatpush3.bf16.msra.mxu0 %v815_v59  ;;  %v807_v5 = vmax.f32 %v775_v61, 0.0  ;;  %p1628_p2 = pnand %p1627_p1, %p1621_p12 }
 0x412   :  { %v770_v3 = vadd.f32 %v1154_v31, %v769_v2  ;;  %1402 = vmatprep.subr.bf16.mxu0 %v816_v58  ;;  %v805_v6 = vmax.f32 %v767_v63, 0.0 }
 0x413   :  { %v808_v4 = vmax.f32 %v778_v1, 0.0 }
 0x414   :  { %v806_v7 = vmax.f32 %v770_v3, 0.0 }
 0x415   :  { %v818_v8 = vpack.c.bf16 %v808_v4, %v807_v5  ;;  %1403 = vmatpush3.bf16.msra.mxu0 %v816_v58 }
 0x416   :  { %v817_v9 = vpack.c.bf16 %v806_v7, %v805_v6  ;;  %v1394_v10 = vpop.f32.mrb[28].mxu1 }
 0x417   :  { %v791_v11 = vadd.f32 %v1394_v10, %v1154_v31  ;;  %v782_v12 = vpop.f32.mrb[29].mxu1 }
 0x418   :  { %v783_v13 = vadd.f32 %v1154_v31, %v782_v12  ;;  %v1395_v16 = vpop.f32.mrb[30].mxu1  ;;  %1404 = vmatprep.subr.bf16.mxu0 %v817_v9 }
 0x419   :  { %v794_v17 = vadd.f32 %v1395_v16, %v1154_v31  ;;  %v785_v23 = vpop.f32.mrb[31].mxu1  ;;  %1405 = vmatpush3.bf16.msra.mxu0 %v817_v9  ;;  %v811_v25 = vmax.f32 %v791_v11, 0.0 }
 0x41a   :  { %v786_v24 = vadd.f32 %v1154_v31, %v785_v23  ;;  %1406 = vmatprep.subr.bf16.mxu0 %v818_v8  ;;  %v809_v27 = vmax.f32 %v783_v13, 0.0  ;;  %v1509_v31 = vld [vmem:[#allocation10 + $0x38] sm:$0xff]  }
 0x41b   :  { %v812_v26 = vmax.f32 %v794_v17, 0.0  ;;  %1442 = vmatprep.subr.bf16.mxu1 %v1509_v31 }
 0x41c   :  { %v810_v28 = vmax.f32 %v786_v24, 0.0  ;;  %1443 = vmatpush3.bf16.msra.mxu1 %v1509_v31 }
 0x41d   :  { %v820_v29 = vpack.c.bf16 %v812_v26, %v811_v25  ;;  %1407 = vmatpush3.bf16.msra.mxu0 %v818_v8 }
 0x41e   :  { %v819_v30 = vpack.c.bf16 %v810_v28, %v809_v27 }
 0x420   :  { %1408 = vmatprep.subr.bf16.mxu0 %v819_v30 }
 0x421   :  { %1409 = vmatpush3.bf16.msra.mxu0 %v819_v30 }
 0x422   :  { %1410 = vmatprep.subr.bf16.mxu0 %v820_v29 }
 0x425   :  { %1411 = vmatpush3.bf16.msra.mxu0 %v820_v29 }
 0x428   :  { %1413 = vmatmul.mubr.bf16.vlgmr.msra.gmra.mrb[32].mxu0 %v1797_v14 }
 0x429   :  { %1416 = vmatprep.mubr.bf16.mxu0 %v1799_v15 }
 0x430   :  { %1417 = vmatmul.mubr.bf16.gmra.mrb[36].mxu0 %v1803_v18 }
 0x431   :  { %1420 = vmatprep.mubr.bf16.mxu0 %v1805_v19 }
 0x438   :  { %1421 = vmatmul.mubr.bf16.gmra.mrb[40].mxu0 %v1809_v20 }
 0x439   :  { %1424 = vmatprep.mubr.bf16.mxu0 %v1811_v21 }
 0x440   :  { %1425 = vmatmul.mubr.bf16.gmra.mrb[44].mxu0 %v1815_v22 }
 0x4fb   :  { %v1414_v32 = vpop.f32.mrb[32].mxu0 }
 0x4fc   :  { %v872_v33 = vpop.f32.mrb[33].mxu0 }
 0x4fd   :  { %v1415_v34 = vpop.f32.mrb[34].mxu0 }
 0x4fe   :  { %v936_v35 = vpack.c.bf16 %v1415_v34, %v1414_v32  ;;  %v875_v14 = vpop.f32.mrb[35].mxu0 }
 0x4ff   :  { %v935_v36 = vpack.c.bf16 %v875_v14, %v872_v33 }
 0x501   :  { %1444 = vmatprep.mubr.bf16.mxu1 %v935_v36 }
 0x502   :  { %1445 = vmatmul.mubr.bf16.vlgmr.msra.gmra.mrb[32].mxu1 %v936_v35 }
 0x503   :  { %v1418_v15 = vpop.f32.mrb[36].mxu0 }
 0x504   :  { %v888_v18 = vpop.f32.mrb[37].mxu0 }
 0x505   :  { %v1419_v19 = vpop.f32.mrb[38].mxu0 }
 0x506   :  { %v938_v37 = vpack.c.bf16 %v1419_v19, %v1418_v15  ;;  %v891_v20 = vpop.f32.mrb[39].mxu0 }
 0x507   :  { %v937_v38 = vpack.c.bf16 %v891_v20, %v888_v18 }
 0x509   :  { %1448 = vmatprep.mubr.bf16.mxu1 %v937_v38 }
 0x50a   :  { %1449 = vmatmul.mubr.bf16.gmra.mrb[36].mxu1 %v938_v37 }
 0x50b   :  { %v1422_v21 = vpop.f32.mrb[40].mxu0 }
 0x50c   :  { %v904_v22 = vpop.f32.mrb[41].mxu0 }
 0x50d   :  { %v1423_v39 = vpop.f32.mrb[42].mxu0 }
 0x50e   :  { %v940_v40 = vpack.c.bf16 %v1423_v39, %v1422_v21  ;;  %v907_v41 = vpop.f32.mrb[43].mxu0 }
 0x50f   :  { %v939_v42 = vpack.c.bf16 %v907_v41, %v904_v22 }
 0x511   :  { %1452 = vmatprep.mubr.bf16.mxu1 %v939_v42 }
 0x512   :  { %1453 = vmatmul.mubr.bf16.gmra.mrb[40].mxu1 %v940_v40 }
 0x513   :  { %v1426_v43 = vpop.f32.mrb[44].mxu0 }
 0x514   :  { %v920_v44 = vpop.f32.mrb[45].mxu0 }
 0x515   :  { %v1427_v45 = vpop.f32.mrb[46].mxu0 }
 0x516   :  { %v942_v46 = vpack.c.bf16 %v1427_v45, %v1426_v43  ;;  %v923_v47 = vpop.f32.mrb[47].mxu0 }
 0x517   :  { %v941_v48 = vpack.c.bf16 %v923_v47, %v920_v44 }
 0x519   :  { %1456 = vmatprep.mubr.bf16.mxu1 %v941_v48 }
 0x51a   :  { %1457 = vmatmul.mubr.bf16.gmra.mrb[44].mxu1 %v942_v46 }
 0x5d5   :  { %v1446_v50 = vpop.f32.mrb[32].mxu1 }
 0x5d6   :  { %v1040_v51 = vadd.f32 %v1446_v50, %v1163_v49  ;;  %v1031_v52 = vpop.f32.mrb[33].mxu1 }
 0x5d7   :  { %v1032_v53 = vadd.f32 %v1163_v49, %v1031_v52  ;;  %v1447_v54 = vpop.f32.mrb[34].mxu1 }
 0x5d8   :  { %1096 = vst [vmem:[#allocation11 + $0x10] sm:$0xff] %v1040_v51  ;;  %v1043_v56 = vadd.f32 %v1447_v54, %v1163_v49  ;;  %v1034_v55 = vpop.f32.mrb[35].mxu1 }
 0x5d9   :  { %1094 = vst [vmem:[#allocation11] sm:$0xff] %v1032_v53  ;;  %v1035_v57 = vadd.f32 %v1163_v49, %v1034_v55 }
 0x5da   :  { %1097 = vst [vmem:[#allocation11 + $0x18] sm:$0xff] %v1043_v56 }
 0x5db   :  { %1095 = vst [vmem:[#allocation11 + $0x8] sm:$0xff] %v1035_v57 }
 0x5dd   :  { %v1450_v58 = vpop.f32.mrb[36].mxu1 }
 0x5de   :  { %v1056_v59 = vadd.f32 %v1450_v58, %v1163_v49  ;;  %v1047_v60 = vpop.f32.mrb[37].mxu1 }
 0x5df   :  { %v1048_v61 = vadd.f32 %v1163_v49, %v1047_v60  ;;  %v1451_v62 = vpop.f32.mrb[38].mxu1 }
 0x5e0   :  { %1100 = vst [vmem:[#allocation11 + $0x30] sm:$0xff] %v1056_v59  ;;  %v1059_v63 = vadd.f32 %v1451_v62, %v1163_v49  ;;  %v1050_v0 = vpop.f32.mrb[39].mxu1 }
 0x5e1   :  { %1098 = vst [vmem:[#allocation11 + $0x20] sm:$0xff] %v1048_v61  ;;  %v1051_v1 = vadd.f32 %v1163_v49, %v1050_v0 }
 0x5e2   :  { %1101 = vst [vmem:[#allocation11 + $0x38] sm:$0xff] %v1059_v63 }
 0x5e3   :  { %1099 = vst [vmem:[#allocation11 + $0x28] sm:$0xff] %v1051_v1 }
 0x5e5   :  { %v1454_v2 = vpop.f32.mrb[40].mxu1 }
 0x5e6   :  { %v1072_v3 = vadd.f32 %v1454_v2, %v1163_v49  ;;  %v1063_v5 = vpop.f32.mrb[41].mxu1 }
 0x5e7   :  { %v1064_v4 = vadd.f32 %v1163_v49, %v1063_v5  ;;  %v1455_v6 = vpop.f32.mrb[42].mxu1 }
 0x5e8   :  { %1104 = vst [vmem:[#allocation11 + $0x50] sm:$0xff] %v1072_v3  ;;  %v1075_v7 = vadd.f32 %v1455_v6, %v1163_v49  ;;  %v1066_v8 = vpop.f32.mrb[43].mxu1 }
 0x5e9   :  { %1102 = vst [vmem:[#allocation11 + $0x40] sm:$0xff] %v1064_v4  ;;  %v1067_v9 = vadd.f32 %v1163_v49, %v1066_v8 }
 0x5ea   :  { %1105 = vst [vmem:[#allocation11 + $0x58] sm:$0xff] %v1075_v7 }
 0x5eb   :  { %1103 = vst [vmem:[#allocation11 + $0x48] sm:$0xff] %v1067_v9 }
 0x5ed   :  { %v1458_v10 = vpop.f32.mrb[44].mxu1 }
 0x5ee   :  { %v1088_v11 = vadd.f32 %v1458_v10, %v1163_v49  ;;  %v1079_v12 = vpop.f32.mrb[45].mxu1 }
 0x5ef   :  { %v1080_v13 = vadd.f32 %v1163_v49, %v1079_v12  ;;  %v1459_v16 = vpop.f32.mrb[46].mxu1 }
 0x5f0   :  { %1108 = vst [vmem:[#allocation11 + $0x70] sm:$0xff] %v1088_v11  ;;  %v1091_v17 = vadd.f32 %v1459_v16, %v1163_v49  ;;  %v1082_v23 = vpop.f32.mrb[47].mxu1 }
 0x5f1   :  { %1106 = vst [vmem:[#allocation11 + $0x60] sm:$0xff] %v1080_v13  ;;  %v1083_v24 = vadd.f32 %v1163_v49, %v1082_v23 }
 0x5f2   :  { %1109 = vst [vmem:[#allocation11 + $0x78] sm:$0xff] %v1091_v17 }
 0x5f3   :  { %1107 = vst [vmem:[#allocation11 + $0x68] sm:$0xff] %v1083_v24 }
 0x5f4   :  { %1631 = shalt.err (!%p1628_p2)
}
 0x5f5   :  { %s1632_s26 = scalar_lea.hbm %s1863_s8, 2048 }
 0x5f6   :  { %p1633_p3 = scmp.ne.s32.totalorder %s1863_s8, %s1632_s26  ;;  %p1636_p4 = scmp.lt.u32.totalorder %s1632_s26, %s1863_s8 }
 0x5f8   :  { %p1638_p5 = pnand %p1636_p4, %p1633_p3 }
 0x5fa   :  { %1641 = shalt.err (!%p1638_p5)
}
 0x5fb   :  { %s1658_s0 = smov 128   ;;  %s1659_s9 = smov 8  }
 0x5fc   :  { %1121 = dma.vmem_to_hbm [thread:$0]  %s1116_s22, 2048, %s1863_s8, [#allocation4], %s1658_s0, %s1658_s0, %s1659_s9  }
 0x5fd   :  { %1648 = dma.done.wait [#allocation4], 2048  }
 0x5fe   :  { %1649 = vsyncadd [#allocation4], 4294965248 }
 0x5ff   :  { %1125 = vsyncpa [#allocation3], 1 }
 0x600   :  { %1126 = vsyncpa [#allocation6], 1 }
 0x601   :  { %1127 = vsyncpa [#allocation9], 1 }
 0x602   :  { %1128 = vsyncpa [#allocation4], 1 }

</bundles_post_ra>
